<compile_context>
chip_gen: v7x
topology: tpu7x:2x2x1
jax: 0.10.0
libtpu: 0.0.40
codegen_flags: <defaults>
</compile_context>

<pallas_src>
import jax
import jax.numpy as jnp
from jax.experimental import pallas as pl
from jax.experimental.pallas import tpu as pltpu


# ---------------------------------------------------------------------------
# kernel
# ---------------------------------------------------------------------------
def symoden_kernel(x_ref, u_ref,
                   wcat_ref, bcat_ref, whvf_ref, gw2_ref, gb2_ref, e8_ref,
                   o_ref):
    cdt = wcat_ref.dtype              # compute dtype for matmul / tanh operands
    HL = whvf_ref.shape[0]            # P * hid  (packed hidden width per net)

    xp = x_ref[...].astype(cdt)       # (rt, 128): 16 samples x 8 features per row

    # --- fused first layer: one MXU push + one tanh for H_net AND g_net hidden ---
    z = jnp.dot(xp, wcat_ref[...], preferred_element_type=jnp.float32)
    a = jnp.tanh(z + bcat_ref[...]).astype(cdt)          # (rt, 2*HL), lane-dense

    ah = a[:, :HL]                    # packed H_net hidden  (512-lane aligned slice)
    ag = a[:, HL:]                    # packed g_net hidden

    # --- Hamiltonian vector field: (1 - h^2) @ ((W1*w2_row).T @ M.T), block-diag ---
    hvf = jnp.dot(1.0 - ah * ah, whvf_ref[...], preferred_element_type=jnp.float32)

    # --- g(q) (+ gb2), already placed in the dp-half of each sample's 8 lanes ---
    gq = jnp.dot(ag, gw2_ref[...], preferred_element_type=jnp.float32) + gb2_ref[...]

    # --- broadcast u to 8 lanes per sample via a tiny constant matmul (lane-dense) ---
    u8 = jnp.dot(u_ref[...], e8_ref[...], preferred_element_type=jnp.float32)

    # single full-width, unmasked store
    o_ref[...] = (hvf + u8 * gq).astype(o_ref.dtype)


# ---------------------------------------------------------------------------
# wrapper
# ---------------------------------------------------------------------------
def symoden_forward(x, u, kparams, *, batch_tile=4096):
    """Forward pass.  x: (bs, D) = (q, p); u: (bs, 1).  kparams from prepare_kernel_params."""
    bs, D = x.shape
    assert 128 % D == 0, "lane packing assumes input_dim divides 128"
    P = 128 // D                                    # samples packed per 128-lane row

    rows = -(-bs // P)                              # packed rows needed
    rt = min(max(1, batch_tile // P), rows)         # packed rows per grid step
    if rt < rows:
        rt = max(8, (rt // 8) * 8)                  # keep sublane (8) alignment when tiling
    nblk = -(-rows // rt)                           # cdiv grid (pad last block, never
    rows_pad = nblk * rt                            #  fall back to one giant block)
    bs_pad = rows_pad * P
    if bs_pad != bs:
        x = jnp.pad(x, ((0, bs_pad - bs), (0, 0)))
        u = jnp.pad(u, ((0, bs_pad - bs), (0, 0)))

    xp = x.reshape(rows_pad, P * D)                 # free reshape: lane-packed batch
    up = u.reshape(rows_pad, P)

    batched = lambda shape: pl.BlockSpec(shape, lambda i: (i, 0))
    resident = lambda arr: pl.BlockSpec(arr.shape, lambda i: (0, 0))   # DMA'd once

    outp = pl.pallas_call(
        symoden_kernel,
        out_shape=jax.ShapeDtypeStruct((rows_pad, P * D), jnp.float32),
        grid=(nblk,),
        in_specs=[
            batched((rt, P * D)),                   # packed x
            batched((rt, P)),                       # packed u (last dim == full dim)
            resident(kparams["WcatBlk"]),           # (128, 2*P*hid) block-diag W1 | gW1
            resident(kparams["bcatTile"]),          # (1,   2*P*hid)
            resident(kparams["WhvfBlk"]),           # (P*hid, 128) block-diag Whvf
            resident(kparams["gW2Blk"]),            # (P*hid, 128) block-diag [0 | gW2]
            resident(kparams["gb2Tile"]),           # (1, 128)
            resident(kparams["E8"]),                # (P, 128) u -> 8-lanes/sample expander
        ],
        out_specs=batched((rt, P * D)),
        compiler_params=pltpu.CompilerParams(
            dimension_semantics=("parallel",),      # shards batch grid across v7x's 2 TCs
            vmem_limit_bytes=32 * 1024 * 1024,
        ),
    )(xp, up, kparams["WcatBlk"], kparams["bcatTile"], kparams["WhvfBlk"],
      kparams["gW2Blk"], kparams["gb2Tile"], kparams["E8"])

    return outp.reshape(bs_pad, D)[:bs]


# ---------------------------------------------------------------------------
# parameter construction / offline preprocessing
# ---------------------------------------------------------------------------
def make_params(key, D, hid):
    n = D // 2
    ks = jax.random.split(key, 8)
    p = {
        "W1": 0.1 * jax.random.normal(ks[0], (D, hid), jnp.float32),
        "b1": 0.1 * jax.random.normal(ks[1], (1, hid), jnp.float32),
        "w2_row": 0.1 * jax.random.normal(ks[2], (1, hid), jnp.float32),  # W2 as (1, HID)
        "gW1": 0.1 * jax.random.normal(ks[3], (n, hid), jnp.float32),
        "gb1": 0.1 * jax.random.normal(ks[4], (1, hid), jnp.float32),
        "gW2": 0.1 * jax.random.normal(ks[5], (hid, n), jnp.float32),
        "gb2": 0.1 * jax.random.normal(ks[6], (1, n), jnp.float32),
    }
    # canonical-coords permutation tensor M = cat([I[D//2:], -I[:D//2]])
    eye = jnp.eye(D, dtype=jnp.float32)
    M = jnp.concatenate([eye[D // 2:], -eye[:D // 2]], axis=0)
    p["MT"] = M.T
    return p


def _block_diag_reps(W, reps):
    r, c = W.shape
    out = jnp.zeros((reps * r, reps * c), W.dtype)
    for j in range(reps):
        out = out.at[j * r:(j + 1) * r, j * c:(j + 1) * c].set(W)
    return out


def prepare_kernel_params(params, D, compute_dtype=jnp.float32):
    """One-time weight preprocessing (static across ODE steps).

    compute_dtype=jnp.bfloat16 is recommended on v6e/v7x (halves VMEM/HBM for the
    tanh intermediate, bf16 MXU rate); keep float32 on v5e.
    """
    assert 128 % D == 0
    n = D // 2
    hid = params["W1"].shape[1]
    P = 128 // D                                        # samples packed per lane row

    # Hamiltonian backward weight: fold w2_row, then the signed permutation M.T
    #   dH = (1 - h^2) @ (W1 * w2_row).T ; h_vf = dH @ M.T
    W1_bwd = (params["W1"] * params["w2_row"]).T        # (hid, D)
    eye = jnp.eye(D, dtype=jnp.float32)
    M = jnp.concatenate([eye[n:], -eye[:n]], axis=0)
    Whvf = W1_bwd @ M.T                                 # (hid, D)

    # g_net pieces padded to the per-sample 8-lane feature slot
    gW1pad = jnp.zeros((D, hid), jnp.float32).at[:n, :].set(params["gW1"])    # q-only input
    gW2pad = jnp.zeros((hid, D), jnp.float32).at[:, n:].set(params["gW2"])    # dp-half output
    gb2pad = jnp.zeros((1, D), jnp.float32).at[:, n:].set(params["gb2"])

    # block-diagonal expansion: one copy per packed sample
    WcatBlk = jnp.concatenate([_block_diag_reps(params["W1"], P),
                               _block_diag_reps(gW1pad, P)], axis=1)          # (128, 2*P*hid)
    bcatTile = jnp.concatenate([jnp.tile(params["b1"], (1, P)),
                                jnp.tile(params["gb1"], (1, P))], axis=1)     # (1, 2*P*hid)
    WhvfBlk = _block_diag_reps(Whvf, P)                                       # (P*hid, 128)
    gW2Blk = _block_diag_reps(gW2pad, P)                                      # (P*hid, 128)
    gb2Tile = jnp.tile(gb2pad, (1, P))                                        # (1, 128)
    E8 = _block_diag_reps(jnp.ones((1, D), jnp.float32), P)                   # (P, 128)

    cast = lambda a: a.astype(compute_dtype)
    return {
        "WcatBlk": cast(WcatBlk),
        "WhvfBlk": cast(WhvfBlk),
        "gW2Blk": cast(gW2Blk),
        # biases / u-expander stay f32: they feed f32 accumulators
        "bcatTile": bcatTile.astype(jnp.float32),
        "gb2Tile": gb2Tile.astype(jnp.float32),
        "E8": E8.astype(jnp.float32),
    }


# ---------------------------------------------------------------------------
# pure-JAX reference (mirrors torch.autograd.grad path of the module)
# ---------------------------------------------------------------------------
def reference_forward(x, u, params):
    def H_fn(qp):
        h = jnp.tanh(qp @ params["W1"] + params["b1"])
        return jnp.sum(h @ params["w2_row"].T)                 # H.sum()

    dH = jax.grad(H_fn)(x)
    h_vf = dH @ params["MT"]
    n = x.shape[1] // 2
    q = x[:, :n]
    gh = jnp.tanh(q @ params["gW1"] + params["gb1"])
    g_q = gh @ params["gW2"] + params["gb2"]
    F = g_q * u
    return h_vf + jnp.concatenate([jnp.zeros_like(F), F], axis=1)


# ---------------------------------------------------------------------------
if __name__ == "__main__":
    D, hid = 8, 32               # input_dim = 8 -> q, p each of size 4
    key = jax.random.PRNGKey(0)
    kx, ku, kp = jax.random.split(key, 3)
    params = make_params(kp, D, hid)
    kparams = prepare_kernel_params(params, D)         # offline, once per model

    # --- small-shape check (bs=2, single grid block) ---
    bs = 2
    x = jax.random.normal(kx, (bs, D), jnp.float32)    # (q, p) concatenated
    u = jax.random.normal(ku, (bs, 1), jnp.float32)    # control input
    out = jax.block_until_ready(symoden_forward(x, u, kparams))
    ref = reference_forward(x, u, params)
    assert out.shape == (bs, D)
    assert jnp.allclose(out, ref, atol=1e-3, rtol=1e-3), "mismatch vs reference (bs=2)"

    # --- multi-block / padded-last-block check (exercises cdiv tiling + parallel grid) ---
    bs2 = 400                                          # not a multiple of tile or of 16
    x2 = jax.random.normal(jax.random.PRNGKey(1), (bs2, D), jnp.float32)
    u2 = jax.random.normal(jax.random.PRNGKey(2), (bs2, 1), jnp.float32)
    out2 = jax.block_until_ready(symoden_forward(x2, u2, kparams, batch_tile=128))
    ref2 = reference_forward(x2, u2, params)
    assert out2.shape == (bs2, D)
    assert jnp.allclose(out2, ref2, atol=1e-3, rtol=1e-3), "mismatch vs reference (bs=400)"

    print("KERNEL_OK")
</pallas_src>

<mosaic_0001>
module attributes {stable_mosaic.version = 11 : i64} {
  func.func @symoden_kernel(%arg0: i32, %arg1: memref<1x128xf32, #tpu.memory_space<vmem>>, %arg2: memref<1x16xf32, #tpu.memory_space<vmem>>, %arg3: memref<128x1024xf32, #tpu.memory_space<vmem>>, %arg4: memref<1x1024xf32, #tpu.memory_space<vmem>>, %arg5: memref<512x128xf32, #tpu.memory_space<vmem>>, %arg6: memref<512x128xf32, #tpu.memory_space<vmem>>, %arg7: memref<1x128xf32, #tpu.memory_space<vmem>>, %arg8: memref<16x128xf32, #tpu.memory_space<vmem>>, %arg9: memref<1x128xf32, #tpu.memory_space<vmem>>) attributes {dimension_semantics = [#tpu.dimension_semantics<parallel>], iteration_bounds = array<i64: 1>, scalar_prefetch = 0 : i64, scratch_operands = 0 : i64, tpu.core_type = #tpu.core_type<tc>, window_params = [{transform_indices = @transform_0, window_bounds = array<i64: 1, 128>}, {transform_indices = @transform_1, window_bounds = array<i64: 1, 16>}, {pipeline_mode = #tpu.pipeline_mode<synchronous>, transform_indices = @transform_2, window_bounds = array<i64: 128, 1024>}, {pipeline_mode = #tpu.pipeline_mode<synchronous>, transform_indices = @transform_3, window_bounds = array<i64: 1, 1024>}, {pipeline_mode = #tpu.pipeline_mode<synchronous>, transform_indices = @transform_4, window_bounds = array<i64: 512, 128>}, {pipeline_mode = #tpu.pipeline_mode<synchronous>, transform_indices = @transform_5, window_bounds = array<i64: 512, 128>}, {pipeline_mode = #tpu.pipeline_mode<synchronous>, transform_indices = @transform_6, window_bounds = array<i64: 1, 128>}, {pipeline_mode = #tpu.pipeline_mode<synchronous>, transform_indices = @transform_7, window_bounds = array<i64: 16, 128>}, {transform_indices = @transform_8, window_bounds = array<i64: 1, 128>}]} {
    %c0 = arith.constant 0 : index
    %c0_0 = arith.constant 0 : index
    %0 = vector.load %arg1[%c0, %c0_0] : memref<1x128xf32, #tpu.memory_space<vmem>>, vector<1x128xf32>
    %c0_1 = arith.constant 0 : index
    %c0_2 = arith.constant 0 : index
    %1 = vector.load %arg3[%c0_1, %c0_2] : memref<128x1024xf32, #tpu.memory_space<vmem>>, vector<128x1024xf32>
    %cst = arith.constant dense<0.000000e+00> : vector<1x1024xf32>
    %2 = tpu.matmul %0, %1, %cst {dimension_numbers = #tpu.dot_dimension_numbers<[1], [0], [0], [1], [0, 0, 1, 1], [], []>} : vector<1x128xf32>, vector<128x1024xf32>, vector<1x1024xf32> -> vector<1x1024xf32>
    %c0_3 = arith.constant 0 : index
    %c0_4 = arith.constant 0 : index
    %3 = vector.load %arg4[%c0_3, %c0_4] : memref<1x1024xf32, #tpu.memory_space<vmem>>, vector<1x1024xf32>
    %4 = arith.addf %2, %3 : vector<1x1024xf32>
    %5 = math.tanh %4 : vector<1x1024xf32>
    %6 = vector.extract_strided_slice %5 {offsets = [0, 0], sizes = [1, 512], strides = [1, 1]} : vector<1x1024xf32> to vector<1x512xf32>
    %7 = vector.extract_strided_slice %5 {offsets = [0, 512], sizes = [1, 512], strides = [1, 1]} : vector<1x1024xf32> to vector<1x512xf32>
    %8 = arith.mulf %6, %6 : vector<1x512xf32>
    %cst_5 = arith.constant 1.000000e+00 : f32
    %9 = vector.broadcast %cst_5 : f32 to vector<1x512xf32>
    %10 = arith.subf %9, %8 : vector<1x512xf32>
    %c0_6 = arith.constant 0 : index
    %c0_7 = arith.constant 0 : index
    %11 = vector.load %arg5[%c0_6, %c0_7] : memref<512x128xf32, #tpu.memory_space<vmem>>, vector<512x128xf32>
    %cst_8 = arith.constant dense<0.000000e+00> : vector<1x128xf32>
    %12 = tpu.matmul %10, %11, %cst_8 {dimension_numbers = #tpu.dot_dimension_numbers<[1], [0], [0], [1], [0, 0, 1, 1], [], []>} : vector<1x512xf32>, vector<512x128xf32>, vector<1x128xf32> -> vector<1x128xf32>
    %c0_9 = arith.constant 0 : index
    %c0_10 = arith.constant 0 : index
    %13 = vector.load %arg6[%c0_9, %c0_10] : memref<512x128xf32, #tpu.memory_space<vmem>>, vector<512x128xf32>
    %cst_11 = arith.constant dense<0.000000e+00> : vector<1x128xf32>
    %14 = tpu.matmul %7, %13, %cst_11 {dimension_numbers = #tpu.dot_dimension_numbers<[1], [0], [0], [1], [0, 0, 1, 1], [], []>} : vector<1x512xf32>, vector<512x128xf32>, vector<1x128xf32> -> vector<1x128xf32>
    %c0_12 = arith.constant 0 : index
    %c0_13 = arith.constant 0 : index
    %15 = vector.load %arg7[%c0_12, %c0_13] : memref<1x128xf32, #tpu.memory_space<vmem>>, vector<1x128xf32>
    %16 = arith.addf %14, %15 : vector<1x128xf32>
    %c0_14 = arith.constant 0 : index
    %c0_15 = arith.constant 0 : index
    %17 = vector.load %arg2[%c0_14, %c0_15] : memref<1x16xf32, #tpu.memory_space<vmem>>, vector<1x16xf32>
    %c0_16 = arith.constant 0 : index
    %c0_17 = arith.constant 0 : index
    %18 = vector.load %arg8[%c0_16, %c0_17] : memref<16x128xf32, #tpu.memory_space<vmem>>, vector<16x128xf32>
    %cst_18 = arith.constant dense<0.000000e+00> : vector<1x128xf32>
    %19 = tpu.matmul %17, %18, %cst_18 {dimension_numbers = #tpu.dot_dimension_numbers<[1], [0], [0], [1], [0, 0, 1, 1], [], []>} : vector<1x16xf32>, vector<16x128xf32>, vector<1x128xf32> -> vector<1x128xf32>
    %20 = arith.mulf %19, %16 : vector<1x128xf32>
    %21 = arith.addf %12, %20 : vector<1x128xf32>
    %c0_19 = arith.constant 0 : index
    %c0_20 = arith.constant 0 : index
    %22 = vector.load %arg9[%c0_19, %c0_20] : memref<1x128xf32, #tpu.memory_space<vmem>>, vector<1x128xf32>
    tpu.vector_store %arg9[%c0_19, %c0_20], %21 {strides = array<i32>} : memref<1x128xf32, #tpu.memory_space<vmem>>, vector<1x128xf32>,
    return
  }
  func.func @transform_0(%arg0: i32) -> (i32, i32) {
    %c0_i32 = arith.constant 0 : i32
    %c0_i32_0 = arith.constant 0 : i32
    return %arg0, %c0_i32 : i32, i32
  }
  func.func @transform_1(%arg0: i32) -> (i32, i32) {
    %c0_i32 = arith.constant 0 : i32
    %c0_i32_0 = arith.constant 0 : i32
    return %arg0, %c0_i32 : i32, i32
  }
  func.func @transform_2(%arg0: i32) -> (i32, i32) {
    %c0_i32 = arith.constant 0 : i32
    %c0_i32_0 = arith.constant 0 : i32
    %c0_i32_1 = arith.constant 0 : i32
    return %c0_i32, %c0_i32_0 : i32, i32
  }
  func.func @transform_3(%arg0: i32) -> (i32, i32) {
    %c0_i32 = arith.constant 0 : i32
    %c0_i32_0 = arith.constant 0 : i32
    %c0_i32_1 = arith.constant 0 : i32
    return %c0_i32, %c0_i32_0 : i32, i32
  }
  func.func @transform_4(%arg0: i32) -> (i32, i32) {
    %c0_i32 = arith.constant 0 : i32
    %c0_i32_0 = arith.constant 0 : i32
    %c0_i32_1 = arith.constant 0 : i32
    return %c0_i32, %c0_i32_0 : i32, i32
  }
  func.func @transform_5(%arg0: i32) -> (i32, i32) {
    %c0_i32 = arith.constant 0 : i32
    %c0_i32_0 = arith.constant 0 : i32
    %c0_i32_1 = arith.constant 0 : i32
    return %c0_i32, %c0_i32_0 : i32, i32
  }
  func.func @transform_6(%arg0: i32) -> (i32, i32) {
    %c0_i32 = arith.constant 0 : i32
    %c0_i32_0 = arith.constant 0 : i32
    %c0_i32_1 = arith.constant 0 : i32
    return %c0_i32, %c0_i32_0 : i32, i32
  }
  func.func @transform_7(%arg0: i32) -> (i32, i32) {
    %c0_i32 = arith.constant 0 : i32
    %c0_i32_0 = arith.constant 0 : i32
    %c0_i32_1 = arith.constant 0 : i32
    return %c0_i32, %c0_i32_0 : i32, i32
  }
  func.func @transform_8(%arg0: i32) -> (i32, i32) {
    %c0_i32 = arith.constant 0 : i32
    %c0_i32_0 = arith.constant 0 : i32
    return %arg0, %c0_i32 : i32, i32
  }
}

</mosaic_0001>

<bundles_post_ra>
// kernel: tpu_custom_call.1
= control target key start
LH: loop header
LB: loop body
LE: loop exit
PB: predicated region body
PF: predicated region fallthrough
CT: control target
= control target key end

     0   :  { %13 = vsyncpa [#allocation3], 0  ;;  %s1785_s0 = inlined_call_operand.hbm [shape: f32[1,128], index: 0, kind: input, shape index: {}]   ;;  %s1786_s1 = inlined_call_operand.vmem [shape: f32[1,16], index: 1, kind: input, shape index: {}]   ;;  %s1787_s2 = inlined_call_operand.hbm [shape: f32[128,1024], index: 2, kind: input, shape index: {}]   ;;  %s1788_s3 = inlined_call_operand.vmem [shape: f32[1,1024], index: 3, kind: input, shape index: {}]   ;;  %s1789_s4 = inlined_call_operand.hbm [shape: f32[512,128], index: 4, kind: input, shape index: {}]   ;;  %s1790_s5 = inlined_call_operand.hbm [shape: f32[512,128], index: 5, kind: input, shape index: {}]   ;;  %s1791_s6 = inlined_call_operand.vmem [shape: f32[1,128], index: 6, kind: input, shape index: {}]   ;;  %s1792_s7 = inlined_call_operand.vmem [shape: f32[16,128], index: 7, kind: input, shape index: {}]   ;;  %s1793_s8 = inlined_call_operand.hbm [shape: f32[1,128], index: 8, kind: output, shape index: {}]  }
   0x1   :  { %14 = vsyncpa [#allocation6], 0 }
   0x2   :  { %15 = vsyncpa [#allocation9], 0 }
   0x3   :  { %16 = vsyncpa [#allocation4], 0  ;;  %s1615_s27 = smov [#allocation5]   ;;  %s1497_s9 = scalar_lea.hbm %s1787_s2, 16384 }
   0x4   :  { %s34_s28 = sshll.u32 %s1615_s27, 4  ;;  %p1498_p0 = scmp.ne.s32.totalorder %s1787_s2, %s1497_s9  ;;  %s35_s28 = int_to_ptr.vmem [resolvable:$true] %s34_s28 }
   0x5   :  { %p1501_p1 = scmp.lt.u32.totalorder %s1497_s9, %s1787_s2 }
   0x7   :  { %p1503_p2 = pnand %p1501_p1, %p1498_p0 }
   0x9   :  { %1506 = shalt.err (!%p1503_p2)
}
   0xa   :  { %s1507_s14 = scalar_lea.vmem %s35_s28, 16384  ;;  %p1512_p4 = scmp.lt.s32.totalorder %s35_s28, %s35_s28 }
   0xb   :  { %p1508_p3 = scmp.ne.s32.totalorder %s35_s28, %s1507_s14  ;;  %p1513_p5 = scmp.lt.s32.totalorder %s1507_s14, %s1507_s14 }
   0xd   :  { %p1514_p6 = por %p1513_p5, %p1512_p4 }
   0xf   :  { %p1515_p7 = pnand %p1514_p6, %p1508_p3 }
  0x11   :  { %1518 = shalt.err (!%p1515_p7)
}
  0x12   :  { %s1616_s15 = smov 1024   ;;  %s1617_s16 = smov 64  }
  0x13   :  { %40 = dma.hbm_to_vmem [thread:$0]  %s1787_s2, 16384, %s35_s28, [#allocation6], %s1616_s15, %s1616_s15, %s1617_s16  }
  0x14   :  { %s1618_s19 = smov [#allocation2]   ;;  %s1619_s21 = smov [#allocation7]  }
  0x15   :  { %s23_s20 = sshll.u32 %s1618_s19, 4  ;;  %s48_s22 = sshll.u32 %s1619_s21, 4  ;;  %s24_s20 = int_to_ptr.vmem [resolvable:$true] %s23_s20  ;;  %s49_s22 = int_to_ptr.vmem [resolvable:$true] %s48_s22 }
  0x16   :  { %s1519_s25 = scalar_lea.hbm %s1785_s0, 16 }
  0x17   :  { %p1520_p8 = scmp.ne.s32.totalorder %s1785_s0, %s1519_s25  ;;  %p1523_p9 = scmp.lt.u32.totalorder %s1519_s25, %s1785_s0 }
  0x19   :  { %p1525_p10 = pnand %p1523_p9, %p1520_p8 }
  0x1b   :  { %1528 = shalt.err (!%p1525_p10)
}
  0x1c   :  { %s1529_s2 = scalar_lea.vmem %s24_s20, 16  ;;  %s1533_s28 = scalar_lea.vmem %s24_s20, 32 }
  0x1d   :  { %p1530_p11 = scmp.ne.s32.totalorder %s24_s20, %s1529_s2  ;;  %p1534_p12 = scmp.lt.s32.totalorder %s24_s20, %s24_s20 }
  0x1e   :  { %p1535_p13 = scmp.lt.s32.totalorder %s1533_s28, %s1529_s2 }
  0x20   :  { %p1536_p0 = por %p1535_p13, %p1534_p12 }
  0x22   :  { %p1537_p1 = pnand %p1536_p0, %p1530_p11 }
  0x24   :  { %1540 = shalt.err (!%p1537_p1)
}
  0x25   :  { %26 = dma.hbm_to_vmem [thread:$0]  %s1785_s0, 16, %s24_s20, [#allocation3]  }
  0x26   :  { %s1541_s13 = scalar_lea.hbm %s1789_s4, 8192 }
  0x27   :  { %p1542_p2 = scmp.ne.s32.totalorder %s1789_s4, %s1541_s13  ;;  %p1545_p3 = scmp.lt.u32.totalorder %s1541_s13, %s1789_s4 }
  0x29   :  { %p1547_p4 = pnand %p1545_p3, %p1542_p2 }
  0x2b   :  { %1550 = shalt.err (!%p1547_p4)
}
  0x2c   :  { %s1551_s18 = scalar_lea.vmem %s49_s22, 8192  ;;  %p1556_p6 = scmp.lt.s32.totalorder %s49_s22, %s49_s22 }
  0x2d   :  { %p1552_p5 = scmp.ne.s32.totalorder %s49_s22, %s1551_s18  ;;  %p1557_p7 = scmp.lt.s32.totalorder %s1551_s18, %s1551_s18 }
  0x2f   :  { %p1558_p8 = por %p1557_p7, %p1556_p6 }
  0x31   :  { %p1559_p9 = pnand %p1558_p8, %p1552_p5 }
  0x33   :  { %1562 = shalt.err (!%p1559_p9)
}
  0x34   :  { %s1620_s0 = smov 128   ;;  %s1621_s19 = smov 8  }
  0x35   :  { %54 = dma.hbm_to_vmem [thread:$0]  %s1789_s4, 8192, %s49_s22, [#allocation6], %s1620_s0, %s1620_s0, %s1621_s19  }
  0x36   :  { %s1622_s23 = smov [#allocation8]   ;;  %s1563_s27 = scalar_lea.hbm %s1790_s5, 8192 }
  0x37   :  { %s60_s24 = sshll.u32 %s1622_s23, 4  ;;  %p1564_p10 = scmp.ne.s32.totalorder %s1790_s5, %s1563_s27  ;;  %s61_s24 = int_to_ptr.vmem [resolvable:$true] %s60_s24 }
  0x38   :  { %p1567_p11 = scmp.lt.u32.totalorder %s1563_s27, %s1790_s5 }
  0x3a   :  { %p1569_p12 = pnand %p1567_p11, %p1564_p10 }
  0x3c   :  { %1572 = shalt.err (!%p1569_p12)
}
  0x3d   :  { %s1573_s9 = scalar_lea.vmem %s61_s24, 8192  ;;  %p1578_p0 = scmp.lt.s32.totalorder %s61_s24, %s61_s24 }
  0x3e   :  { %p1574_p13 = scmp.ne.s32.totalorder %s61_s24, %s1573_s9  ;;  %p1579_p1 = scmp.lt.s32.totalorder %s1573_s9, %s1573_s9 }
  0x40   :  { %p1580_p2 = por %p1579_p1, %p1578_p0 }
  0x42   :  { %p1581_p3 = pnand %p1580_p2, %p1574_p13 }
  0x44   :  { %1584 = shalt.err (!%p1581_p3)
}
  0x45   :  { %66 = dma.hbm_to_vmem [thread:$0]  %s1790_s5, 8192, %s61_s24, [#allocation9], %s1620_s0, %s1620_s0, %s1621_s19  }
  0x46   :  { %1607 = dma.done.wait [#allocation3], 16  }
  0x47   :  { %1608 = vsyncadd [#allocation3], 4294967280 }
  0x48   :  { %1609 = dma.done.wait [#allocation6], 24576  }
  0x49   :  { %1610 = vsyncadd [#allocation6], 4294942720 }
  0x4a   :  { %1611 = dma.done.wait [#allocation9], 8192  }
  0x4b   :  { %1612 = vsyncadd [#allocation9], 4294959104  ;;  %v1623_v0 = vmov 0.0   ;;  %v85_v1 = vld [vmem:[#allocation5 + $0x8] sm:$0xff]  ;;  %v87_v3 = vld [vmem:[#allocation5 + $0x18] sm:$0xff]  ;;  %vm826_vm0 = vcmask 130048  }
  0x4c   :  { %318 = vmatprep.mubr.f32.mxu0 %v1623_v0  ;;  %389 = vmatprep.mubr.f32.mxu1 %v1623_v0  ;;  %v93_v2 = vld [vmem:[#allocation5 + $0x48] sm:$0xff]  ;;  %v95_v5 = vld [vmem:[#allocation5 + $0x58] sm:$0xff]  ;;  %v84_v6 = vld [vmem:[#allocation5] sm:$0xff]  ;;  %vm1625_vm1 = vmmov 0   ;;  %s1626_s16 = smov [#allocation10]  }
  0x4d   :  { %v1210_v4 = vpack.c.bf16 %v93_v2, %v85_v1  ;;  %v92_v7 = vld [vmem:[#allocation5 + $0x40] sm:$0xff]  ;;  %v1242_v8 = vpack.c.bf16 %v95_v5, %v87_v3  ;;  %v86_v10 = vld [vmem:[#allocation5 + $0x10] sm:$0xff]  ;;  %v101_v12 = vld [vmem:[#allocation5 + $0x88] sm:$0xff]  ;;  %s1048_s17 = sshll.u32 %s1626_s16, 4  ;;  %s1049_s17 = int_to_ptr.vmem [resolvable:$true] %s1048_s17 }
  0x4e   :  { %v1212_v9 = vpack.c.bf16 %v92_v7, %v84_v6  ;;  %v94_v11 = vld [vmem:[#allocation5 + $0x50] sm:$0xff]  ;;  %v109_v14 = vld [vmem:[#allocation5 + $0xc8] sm:$0xff]  ;;  %v103_v15 = vld [vmem:[#allocation5 + $0x98] sm:$0xff]  ;;  %s1589_s18 = scalar_lea.vmem %s1049_s17, 32  ;;  %p1590_p5 = scmp.lt.s32.totalorder %s1049_s17, %s1049_s17 }
  0x4f   :  { %1211 = vmatprep.subr.bf16.mxu0 %v1210_v4  ;;  %v1244_v13 = vpack.c.bf16 %v94_v11, %v86_v10  ;;  %v111_v16 = vld [vmem:[#allocation5 + $0xd8] sm:$0xff]  ;;  %1243 = vmatprep.subr.bf16.mxu1 %v1242_v8  ;;  %v1214_v17 = vpack.c.bf16 %v109_v14, %v101_v12  ;;  %v100_v19 = vld [vmem:[#allocation5 + $0x80] sm:$0xff]  ;;  %v102_v21 = vld [vmem:[#allocation5 + $0x90] sm:$0xff] }
  0x50   :  { %1213 = vmatpush1.bf16.msra.mxu0 %v1212_v9  ;;  %v1246_v18 = vpack.c.bf16 %v111_v16, %v103_v15  ;;  %v108_v20 = vld [vmem:[#allocation5 + $0xc0] sm:$0xff]  ;;  %v110_v23 = vld [vmem:[#allocation5 + $0xd0] sm:$0xff]  ;;  %v117_v24 = vld [vmem:[#allocation5 + $0x108] sm:$0xff] }
  0x51   :  { %1245 = vmatpush1.bf16.msra.mxu1 %v1244_v13  ;;  %v1216_v22 = vpack.c.bf16 %v108_v20, %v100_v19  ;;  %v125_v25 = vld [vmem:[#allocation5 + $0x148] sm:$0xff]  ;;  %1215 = vmatprep.subr.bf16.mxu0 %v1214_v17  ;;  %v1248_v26 = vpack.c.bf16 %v110_v23, %v102_v21  ;;  %v119_v28 = vld [vmem:[#allocation5 + $0x118] sm:$0xff]  ;;  %v116_v30 = vld [vmem:[#allocation5 + $0x100] sm:$0xff] }
  0x52   :  { %1247 = vmatprep.subr.bf16.mxu1 %v1246_v18  ;;  %v1218_v27 = vpack.c.bf16 %v125_v25, %v117_v24  ;;  %v127_v29 = vld [vmem:[#allocation5 + $0x158] sm:$0xff]  ;;  %v124_v32 = vld [vmem:[#allocation5 + $0x140] sm:$0xff]  ;;  %v118_v33 = vld [vmem:[#allocation5 + $0x110] sm:$0xff] }
  0x53   :  { %v1250_v31 = vpack.c.bf16 %v127_v29, %v119_v28  ;;  %v126_v34 = vld [vmem:[#allocation5 + $0x150] sm:$0xff]  ;;  %v1220_v35 = vpack.c.bf16 %v124_v32, %v116_v30  ;;  %v133_v36 = vld [vmem:[#allocation5 + $0x188] sm:$0xff]  ;;  %v135_v38 = vld [vmem:[#allocation5 + $0x198] sm:$0xff] }
  0x54   :  { %1217 = vmatpush1.bf16.msra.mxu0 %v1216_v22  ;;  %v141_v37 = vld [vmem:[#allocation5 + $0x1c8] sm:$0xff]  ;;  %v1252_v39 = vpack.c.bf16 %v126_v34, %v118_v33  ;;  %v143_v41 = vld [vmem:[#allocation5 + $0x1d8] sm:$0xff]  ;;  %v132_v42 = vld [vmem:[#allocation5 + $0x180] sm:$0xff] }
  0x55   :  { %1249 = vmatpush1.bf16.msra.mxu1 %v1248_v26  ;;  %1219 = vmatprep.subr.bf16.mxu0 %v1218_v27  ;;  %v1222_v40 = vpack.c.bf16 %v141_v37, %v133_v36  ;;  %v140_v43 = vld [vmem:[#allocation5 + $0x1c0] sm:$0xff]  ;;  %v1254_v44 = vpack.c.bf16 %v143_v41, %v135_v38  ;;  %v134_v45 = vld [vmem:[#allocation5 + $0x190] sm:$0xff]  ;;  %v149_v47 = vld [vmem:[#allocation5 + $0x208] sm:$0xff] }
  0x56   :  { %1251 = vmatprep.subr.bf16.mxu1 %v1250_v31  ;;  %v142_v46 = vld [vmem:[#allocation5 + $0x1d0] sm:$0xff]  ;;  %v157_v48 = vld [vmem:[#allocation5 + $0x248] sm:$0xff]  ;;  %v151_v49 = vld [vmem:[#allocation5 + $0x218] sm:$0xff]  ;;  %v1224_v51 = vpack.c.bf16 %v140_v43, %v132_v42 }
  0x57   :  { %v159_v50 = vld [vmem:[#allocation5 + $0x258] sm:$0xff]  ;;  %v1256_v52 = vpack.c.bf16 %v142_v46, %v134_v45  ;;  %v1226_v53 = vpack.c.bf16 %v157_v48, %v149_v47  ;;  %v148_v54 = vld [vmem:[#allocation5 + $0x200] sm:$0xff]  ;;  %v150_v56 = vld [vmem:[#allocation5 + $0x210] sm:$0xff] }
  0x58   :  { %1221 = vmatpush1.bf16.msra.mxu0 %v1220_v35  ;;  %v156_v55 = vld [vmem:[#allocation5 + $0x240] sm:$0xff]  ;;  %v1258_v57 = vpack.c.bf16 %v159_v50, %v151_v49  ;;  %v158_v58 = vld [vmem:[#allocation5 + $0x250] sm:$0xff]  ;;  %v165_v59 = vld [vmem:[#allocation5 + $0x288] sm:$0xff] }
  0x59   :  { %1253 = vmatpush1.bf16.msra.mxu1 %v1252_v39  ;;  %1223 = vmatprep.subr.bf16.mxu0 %v1222_v40  ;;  %v173_v60 = vld [vmem:[#allocation5 + $0x2c8] sm:$0xff]  ;;  %v167_v61 = vld [vmem:[#allocation5 + $0x298] sm:$0xff]  ;;  %v1228_v63 = vpack.c.bf16 %v156_v55, %v148_v54  ;;  %v1260_v1 = vpack.c.bf16 %v158_v58, %v150_v56  ;;  %v164_v3 = vld [vmem:[#allocation5 + $0x280] sm:$0xff] }
  0x5a   :  { %1255 = vmatprep.subr.bf16.mxu1 %v1254_v44  ;;  %v175_v62 = vld [vmem:[#allocation5 + $0x2d8] sm:$0xff]  ;;  %v1230_v2 = vpack.c.bf16 %v173_v60, %v165_v59  ;;  %v172_v4 = vld [vmem:[#allocation5 + $0x2c0] sm:$0xff]  ;;  %v166_v5 = vld [vmem:[#allocation5 + $0x290] sm:$0xff] }
  0x5b   :  { %v1262_v6 = vpack.c.bf16 %v175_v62, %v167_v61  ;;  %v174_v7 = vld [vmem:[#allocation5 + $0x2d0] sm:$0xff]  ;;  %v181_v8 = vld [vmem:[#allocation5 + $0x308] sm:$0xff]  ;;  %v183_v10 = vld [vmem:[#allocation5 + $0x318] sm:$0xff]  ;;  %v1232_v12 = vpack.c.bf16 %v172_v4, %v164_v3 }
  0x5c   :  { %1225 = vmatpush1.bf16.msra.mxu0 %v1224_v51  ;;  %v189_v9 = vld [vmem:[#allocation5 + $0x348] sm:$0xff]  ;;  %v191_v11 = vld [vmem:[#allocation5 + $0x358] sm:$0xff]  ;;  %v1264_v13 = vpack.c.bf16 %v174_v7, %v166_v5  ;;  %v180_v15 = vld [vmem:[#allocation5 + $0x300] sm:$0xff] }
  0x5d   :  { %1257 = vmatpush1.bf16.msra.mxu1 %v1256_v52  ;;  %1227 = vmatprep.subr.bf16.mxu0 %v1226_v53  ;;  %v1234_v14 = vpack.c.bf16 %v189_v9, %v181_v8  ;;  %v188_v16 = vld [vmem:[#allocation5 + $0x340] sm:$0xff]  ;;  %v182_v17 = vld [vmem:[#allocation5 + $0x310] sm:$0xff]  ;;  %v1266_v18 = vpack.c.bf16 %v191_v11, %v183_v10  ;;  %v197_v20 = vld [vmem:[#allocation5 + $0x388] sm:$0xff] }
  0x5e   :  { %1259 = vmatprep.subr.bf16.mxu1 %v1258_v57  ;;  %v190_v19 = vld [vmem:[#allocation5 + $0x350] sm:$0xff]  ;;  %v205_v21 = vld [vmem:[#allocation5 + $0x3c8] sm:$0xff]  ;;  %v199_v22 = vld [vmem:[#allocation5 + $0x398] sm:$0xff]  ;;  %v1236_v24 = vpack.c.bf16 %v188_v16, %v180_v15 }
  0x5f   :  { %v207_v23 = vld [vmem:[#allocation5 + $0x3d8] sm:$0xff]  ;;  %v1268_v25 = vpack.c.bf16 %v190_v19, %v182_v17  ;;  %v1238_v26 = vpack.c.bf16 %v205_v21, %v197_v20  ;;  %v196_v27 = vld [vmem:[#allocation5 + $0x380] sm:$0xff]  ;;  %v198_v29 = vld [vmem:[#allocation5 + $0x390] sm:$0xff] }
  0x60   :  { %1229 = vmatpush1.bf16.msra.mxu0 %v1228_v63  ;;  %v204_v28 = vld [vmem:[#allocation5 + $0x3c0] sm:$0xff]  ;;  %v1270_v30 = vpack.c.bf16 %v207_v23, %v199_v22  ;;  %v206_v31 = vld [vmem:[#allocation5 + $0x3d0] sm:$0xff]  ;;  %v89_v32 = vld [vmem:[#allocation5 + $0x28] sm:$0xff] }
  0x61   :  { %1261 = vmatpush1.bf16.msra.mxu1 %v1260_v1  ;;  %1231 = vmatprep.subr.bf16.mxu0 %v1230_v2  ;;  %v97_v33 = vld [vmem:[#allocation5 + $0x68] sm:$0xff]  ;;  %v91_v34 = vld [vmem:[#allocation5 + $0x38] sm:$0xff]  ;;  %v1240_v36 = vpack.c.bf16 %v204_v28, %v196_v27  ;;  %v1272_v37 = vpack.c.bf16 %v206_v31, %v198_v29  ;;  %v88_v39 = vld [vmem:[#allocation5 + $0x20] sm:$0xff] }
  0x62   :  { %1263 = vmatprep.subr.bf16.mxu1 %v1262_v6  ;;  %v99_v35 = vld [vmem:[#allocation5 + $0x78] sm:$0xff]  ;;  %v1274_v38 = vpack.c.bf16 %v97_v33, %v89_v32  ;;  %v96_v40 = vld [vmem:[#allocation5 + $0x60] sm:$0xff]  ;;  %v90_v41 = vld [vmem:[#allocation5 + $0x30] sm:$0xff] }
  0x63   :  { %v1306_v42 = vpack.c.bf16 %v99_v35, %v91_v34  ;;  %v98_v43 = vld [vmem:[#allocation5 + $0x70] sm:$0xff]  ;;  %v105_v44 = vld [vmem:[#allocation5 + $0xa8] sm:$0xff]  ;;  %v107_v46 = vld [vmem:[#allocation5 + $0xb8] sm:$0xff]  ;;  %v1276_v49 = vpack.c.bf16 %v96_v40, %v88_v39 }
  0x64   :  { %1233 = vmatpush1.bf16.msra.mxu0 %v1232_v12  ;;  %v113_v45 = vld [vmem:[#allocation5 + $0xe8] sm:$0xff]  ;;  %v115_v47 = vld [vmem:[#allocation5 + $0xf8] sm:$0xff]  ;;  %v1308_v50 = vpack.c.bf16 %v98_v43, %v90_v41  ;;  %v104_v52 = vld [vmem:[#allocation5 + $0xa0] sm:$0xff] }
  0x65   :  { %1265 = vmatpush1.bf16.msra.mxu1 %v1264_v13  ;;  %1235 = vmatprep.subr.bf16.mxu0 %v1234_v14  ;;  %v1722_v48 = vld [vmem:[#allocation2] sm:$0x1]  ;;  %v1278_v51 = vpack.c.bf16 %v113_v45, %v105_v44  ;;  %v112_v53 = vld [vmem:[#allocation5 + $0xe0] sm:$0xff]  ;;  %v106_v54 = vld [vmem:[#allocation5 + $0xb0] sm:$0xff]  ;;  %v1310_v55 = vpack.c.bf16 %v115_v47, %v107_v46 }
  0x66   :  { %1267 = vmatprep.subr.bf16.mxu1 %v1266_v18  ;;  %v114_v56 = vld [vmem:[#allocation5 + $0xf0] sm:$0xff]  ;;  %v121_v57 = vld [vmem:[#allocation5 + $0x128] sm:$0xff]  ;;  %v123_v59 = vld [vmem:[#allocation5 + $0x138] sm:$0xff]  ;;  %v1280_v61 = vpack.c.bf16 %v112_v53, %v104_v52 }
  0x67   :  { %v129_v58 = vld [vmem:[#allocation5 + $0x168] sm:$0xff]  ;;  %v131_v60 = vld [vmem:[#allocation5 + $0x178] sm:$0xff]  ;;  %v1312_v62 = vpack.c.bf16 %v114_v56, %v106_v54  ;;  %v120_v1 = vld [vmem:[#allocation5 + $0x120] sm:$0xff] }
  0x68   :  { %1237 = vmatpush1.bf16.msra.mxu0 %v1236_v24  ;;  %v1282_v63 = vpack.c.bf16 %v129_v58, %v121_v57  ;;  %v128_v2 = vld [vmem:[#allocation5 + $0x160] sm:$0xff]  ;;  %v122_v3 = vld [vmem:[#allocation5 + $0x130] sm:$0xff]  ;;  %v1314_v4 = vpack.c.bf16 %v131_v60, %v123_v59  ;;  %v137_v6 = vld [vmem:[#allocation5 + $0x1a8] sm:$0xff] }
  0x69   :  { %1269 = vmatpush1.bf16.msra.mxu1 %v1268_v25  ;;  %1239 = vmatprep.subr.bf16.mxu0 %v1238_v26  ;;  %v130_v5 = vld [vmem:[#allocation5 + $0x170] sm:$0xff]  ;;  %v145_v7 = vld [vmem:[#allocation5 + $0x1e8] sm:$0xff]  ;;  %v139_v8 = vld [vmem:[#allocation5 + $0x1b8] sm:$0xff]  ;;  %v1284_v10 = vpack.c.bf16 %v128_v2, %v120_v1 }
  0x6a   :  { %1271 = vmatprep.subr.bf16.mxu1 %v1270_v30  ;;  %v147_v9 = vld [vmem:[#allocation5 + $0x1f8] sm:$0xff]  ;;  %v1316_v11 = vpack.c.bf16 %v130_v5, %v122_v3  ;;  %v1286_v12 = vpack.c.bf16 %v145_v7, %v137_v6  ;;  %v136_v13 = vld [vmem:[#allocation5 + $0x1a0] sm:$0xff]  ;;  %v138_v15 = vld [vmem:[#allocation5 + $0x1b0] sm:$0xff] }
  0x6b   :  { %v144_v14 = vld [vmem:[#allocation5 + $0x1e0] sm:$0xff]  ;;  %v1318_v16 = vpack.c.bf16 %v147_v9, %v139_v8  ;;  %v146_v17 = vld [vmem:[#allocation5 + $0x1f0] sm:$0xff]  ;;  %v153_v18 = vld [vmem:[#allocation5 + $0x228] sm:$0xff] }
  0x6c   :  { %1241 = vmatpush1.bf16.msra.mxu0 %v1240_v36  ;;  %v161_v19 = vld [vmem:[#allocation5 + $0x268] sm:$0xff]  ;;  %v155_v20 = vld [vmem:[#allocation5 + $0x238] sm:$0xff]  ;;  %v1288_v22 = vpack.c.bf16 %v144_v14, %v136_v13  ;;  %v1320_v23 = vpack.c.bf16 %v146_v17, %v138_v15  ;;  %v152_v25 = vld [vmem:[#allocation5 + $0x220] sm:$0xff] }
  0x6d   :  { %1273 = vmatpush1.bf16.msra.mxu1 %v1272_v37  ;;  %1275 = vmatprep.subr.bf16.mxu0 %v1274_v38  ;;  %v163_v21 = vld [vmem:[#allocation5 + $0x278] sm:$0xff]  ;;  %v1290_v24 = vpack.c.bf16 %v161_v19, %v153_v18  ;;  %v160_v26 = vld [vmem:[#allocation5 + $0x260] sm:$0xff]  ;;  %v154_v27 = vld [vmem:[#allocation5 + $0x230] sm:$0xff] }
  0x6e   :  { %1307 = vmatprep.subr.bf16.mxu1 %v1306_v42  ;;  %v1322_v28 = vpack.c.bf16 %v163_v21, %v155_v20  ;;  %v162_v29 = vld [vmem:[#allocation5 + $0x270] sm:$0xff]  ;;  %v169_v30 = vld [vmem:[#allocation5 + $0x2a8] sm:$0xff]  ;;  %v171_v32 = vld [vmem:[#allocation5 + $0x2b8] sm:$0xff]  ;;  %v1292_v34 = vpack.c.bf16 %v160_v26, %v152_v25 }
  0x6f   :  { %319 = vmatmul.mubr.f32.vlgmr.msra.gmra.mrb[0].mxu0 %v1722_v48  ;;  %v177_v31 = vld [vmem:[#allocation5 + $0x2e8] sm:$0xff]  ;;  %v179_v33 = vld [vmem:[#allocation5 + $0x2f8] sm:$0xff]  ;;  %v1324_v35 = vpack.c.bf16 %v162_v29, %v154_v27  ;;  %v168_v37 = vld [vmem:[#allocation5 + $0x2a0] sm:$0xff] }
  0x70   :  { %390 = vmatmul.mubr.f32.vlgmr.msra.gmra.mrb[0].mxu1 %v1722_v48  ;;  %1277 = vmatpush1.bf16.msra.mxu0 %v1276_v49  ;;  %v1294_v36 = vpack.c.bf16 %v177_v31, %v169_v30  ;;  %v176_v38 = vld [vmem:[#allocation5 + $0x2e0] sm:$0xff]  ;;  %v170_v39 = vld [vmem:[#allocation5 + $0x2b0] sm:$0xff]  ;;  %v1326_v40 = vpack.c.bf16 %v179_v33, %v171_v32  ;;  %v185_v42 = vld [vmem:[#allocation5 + $0x328] sm:$0xff] }
  0x71   :  { %1309 = vmatpush1.bf16.msra.mxu1 %v1308_v50  ;;  %1279 = vmatprep.subr.bf16.mxu0 %v1278_v51  ;;  %v178_v41 = vld [vmem:[#allocation5 + $0x2f0] sm:$0xff]  ;;  %v193_v43 = vld [vmem:[#allocation5 + $0x368] sm:$0xff]  ;;  %v187_v44 = vld [vmem:[#allocation5 + $0x338] sm:$0xff]  ;;  %v1296_v46 = vpack.c.bf16 %v176_v38, %v168_v37 }
  0x72   :  { %1311 = vmatprep.subr.bf16.mxu1 %v1310_v55  ;;  %460 = vmatprep.mubr.f32.mxu0 %v1623_v0  ;;  %v195_v45 = vld [vmem:[#allocation5 + $0x378] sm:$0xff]  ;;  %v1328_v47 = vpack.c.bf16 %v178_v41, %v170_v39  ;;  %v1298_v49 = vpack.c.bf16 %v193_v43, %v185_v42  ;;  %v184_v50 = vld [vmem:[#allocation5 + $0x320] sm:$0xff]  ;;  %v186_v52 = vld [vmem:[#allocation5 + $0x330] sm:$0xff] }
  0x73   :  { %531 = vmatprep.mubr.f32.mxu1 %v1623_v0  ;;  %v192_v51 = vld [vmem:[#allocation5 + $0x360] sm:$0xff]  ;;  %v1330_v53 = vpack.c.bf16 %v195_v45, %v187_v44  ;;  %v194_v54 = vld [vmem:[#allocation5 + $0x370] sm:$0xff]  ;;  %v201_v55 = vld [vmem:[#allocation5 + $0x3a8] sm:$0xff] }
  0x74   :  { %1281 = vmatpush1.bf16.msra.mxu0 %v1280_v61  ;;  %v209_v56 = vld [vmem:[#allocation5 + $0x3e8] sm:$0xff]  ;;  %v203_v57 = vld [vmem:[#allocation5 + $0x3b8] sm:$0xff]  ;;  %v1300_v59 = vpack.c.bf16 %v192_v51, %v184_v50  ;;  %v1332_v60 = vpack.c.bf16 %v194_v54, %v186_v52  ;;  %v202_v2 = vld [vmem:[#allocation5 + $0x3b0] sm:$0xff] }
  0x75   :  { %1313 = vmatpush1.bf16.msra.mxu1 %v1312_v62  ;;  %1283 = vmatprep.subr.bf16.mxu0 %v1282_v63  ;;  %v211_v58 = vld [vmem:[#allocation5 + $0x3f8] sm:$0xff]  ;;  %v1302_v61 = vpack.c.bf16 %v209_v56, %v201_v55  ;;  %v200_v62 = vld [vmem:[#allocation5 + $0x3a0] sm:$0xff]  ;;  %v210_v3 = vld [vmem:[#allocation5 + $0x3f0] sm:$0xff] }
  0x76   :  { %1315 = vmatprep.subr.bf16.mxu1 %v1314_v4  ;;  %v208_v63 = vld [vmem:[#allocation5 + $0x3e0] sm:$0xff]  ;;  %v1334_v1 = vpack.c.bf16 %v211_v58, %v203_v57  ;;  %v1336_v5 = vpack.c.bf16 %v210_v3, %v202_v2  ;;  %v635_v7 = vld [vmem:[#allocation8 + $0x88] sm:$0xff]  ;;  %v636_v18 = vld [vmem:[#allocation8 + $0x90] sm:$0xff] }
  0x77   :  { %v1304_v4 = vpack.c.bf16 %v208_v63, %v200_v62  ;;  %v634_v6 = vld [vmem:[#allocation8 + $0x80] sm:$0xff]  ;;  %v637_v19 = vld [vmem:[#allocation8 + $0x98] sm:$0xff]  ;;  %v668_v20 = vld [vmem:[#allocation8 + $0x190] sm:$0xff] }
  0x78   :  { %1285 = vmatpush1.bf16.msra.mxu0 %v1284_v10  ;;  %v666_v8 = vld [vmem:[#allocation8 + $0x180] sm:$0xff]  ;;  %v1338_v9 = vpack.c.bf16 %v635_v7, %v634_v6  ;;  %v667_v10 = vld [vmem:[#allocation8 + $0x188] sm:$0xff]  ;;  %v669_v21 = vld [vmem:[#allocation8 + $0x198] sm:$0xff] }
  0x79   :  { %1317 = vmatpush1.bf16.msra.mxu1 %v1316_v11  ;;  %1287 = vmatprep.subr.bf16.mxu0 %v1286_v12  ;;  %v618_v11 = vld [vmem:[#allocation8] sm:$0xff]  ;;  %v619_v12 = vld [vmem:[#allocation8 + $0x8] sm:$0xff]  ;;  %v1370_v13 = vpack.c.bf16 %v667_v10, %v666_v8  ;;  %v652_v26 = vld [vmem:[#allocation8 + $0x110] sm:$0xff] }
  0x7a   :  { %1319 = vmatprep.subr.bf16.mxu1 %v1318_v16  ;;  %v1340_v14 = vpack.c.bf16 %v619_v12, %v618_v11  ;;  %v650_v15 = vld [vmem:[#allocation8 + $0x100] sm:$0xff]  ;;  %v651_v16 = vld [vmem:[#allocation8 + $0x108] sm:$0xff]  ;;  %v653_v27 = vld [vmem:[#allocation8 + $0x118] sm:$0xff] }
  0x7b   :  { %v1372_v17 = vpack.c.bf16 %v651_v16, %v650_v15  ;;  %v1376_v29 = vpack.c.bf16 %v653_v27, %v652_v26  ;;  %v639_v30 = vld [vmem:[#allocation8 + $0xa8] sm:$0xff]  ;;  %v670_v31 = vld [vmem:[#allocation8 + $0x1a0] sm:$0xff]  ;;  %v641_v41 = vld [vmem:[#allocation8 + $0xb8] sm:$0xff] }
  0x7c   :  { %1289 = vmatpush1.bf16.msra.mxu0 %v1288_v22  ;;  %v620_v22 = vld [vmem:[#allocation8 + $0x10] sm:$0xff]  ;;  %v671_v32 = vld [vmem:[#allocation8 + $0x1a8] sm:$0xff]  ;;  %v654_v37 = vld [vmem:[#allocation8 + $0x120] sm:$0xff] }
  0x7d   :  { %1321 = vmatpush1.bf16.msra.mxu1 %v1320_v23  ;;  %1291 = vmatprep.subr.bf16.mxu0 %v1290_v24  ;;  %v621_v23 = vld [vmem:[#allocation8 + $0x18] sm:$0xff]  ;;  %v1374_v24 = vpack.c.bf16 %v669_v21, %v668_v20  ;;  %v655_v39 = vld [vmem:[#allocation8 + $0x128] sm:$0xff]  ;;  %v672_v44 = vld [vmem:[#allocation8 + $0x1b0] sm:$0xff] }
  0x7e   :  { %1323 = vmatprep.subr.bf16.mxu1 %v1322_v28  ;;  %v1344_v25 = vpack.c.bf16 %v621_v23, %v620_v22  ;;  %v638_v28 = vld [vmem:[#allocation8 + $0xa0] sm:$0xff]  ;;  %v1380_v42 = vpack.c.bf16 %v655_v39, %v654_v37  ;;  %v673_v45 = vld [vmem:[#allocation8 + $0x1b8] sm:$0xff]  ;;  %v656_v50 = vld [vmem:[#allocation8 + $0x130] sm:$0xff] }
  0x7f   :  { %v1346_v33 = vpack.c.bf16 %v639_v30, %v638_v28  ;;  %v657_v51 = vld [vmem:[#allocation8 + $0x138] sm:$0xff]  ;;  %v643_v54 = vld [vmem:[#allocation8 + $0xc8] sm:$0xff]  ;;  %v674_v55 = vld [vmem:[#allocation8 + $0x1c0] sm:$0xff] }
  0x80   :  { %1293 = vmatpush1.bf16.msra.mxu0 %v1292_v34  ;;  %v1378_v34 = vpack.c.bf16 %v671_v32, %v670_v31  ;;  %v1384_v56 = vpack.c.bf16 %v657_v51, %v656_v50  ;;  %v675_v58 = vld [vmem:[#allocation8 + $0x1c8] sm:$0xff]  ;;  %v658_v62 = vld [vmem:[#allocation8 + $0x140] sm:$0xff]  ;;  %v644_v3 = vld [vmem:[#allocation8 + $0xd0] sm:$0xff] }
  0x81   :  { %1325 = vmatpush1.bf16.msra.mxu1 %v1324_v35  ;;  %1295 = vmatprep.subr.bf16.mxu0 %v1294_v36  ;;  %v622_v35 = vld [vmem:[#allocation8 + $0x20] sm:$0xff]  ;;  %v623_v36 = vld [vmem:[#allocation8 + $0x28] sm:$0xff]  ;;  %v677_v7 = vld [vmem:[#allocation8 + $0x1d8] sm:$0xff] }
  0x82   :  { %1327 = vmatprep.subr.bf16.mxu1 %v1326_v40  ;;  %v1348_v38 = vpack.c.bf16 %v623_v36, %v622_v35  ;;  %v640_v40 = vld [vmem:[#allocation8 + $0xb0] sm:$0xff]  ;;  %v646_v15 = vld [vmem:[#allocation8 + $0xe0] sm:$0xff]  ;;  %v647_v16 = vld [vmem:[#allocation8 + $0xe8] sm:$0xff] }
  0x83   :  { %v1350_v43 = vpack.c.bf16 %v641_v41, %v640_v40  ;;  %v628_v8 = vld [vmem:[#allocation8 + $0x50] sm:$0xff]  ;;  %v630_v20 = vld [vmem:[#allocation8 + $0x60] sm:$0xff]  ;;  %v649_v27 = vld [vmem:[#allocation8 + $0xf8] sm:$0xff]  ;;  %v1624_v41 = vmov 0.0|0.0  }
  0x84   :  { %1297 = vmatpush1.bf16.msra.mxu0 %v1296_v46  ;;  %v624_v46 = vld [vmem:[#allocation8 + $0x30] sm:$0xff]  ;;  %v662_v23 = vld [vmem:[#allocation8 + $0x160] sm:$0xff]  ;;  %v665_v36 = vld [vmem:[#allocation8 + $0x178] sm:$0xff] }
  0x85   :  { %1329 = vmatpush1.bf16.msra.mxu1 %v1328_v47  ;;  %1299 = vmatprep.subr.bf16.mxu0 %v1298_v49  ;;  %v1382_v47 = vpack.c.bf16 %v673_v45, %v672_v44  ;;  %v625_v49 = vld [vmem:[#allocation8 + $0x38] sm:$0xff]  ;;  %v660_v12 = vld [vmem:[#allocation8 + $0x150] sm:$0xff]  ;;  %v571_v39 = vld [vmem:[#allocation7 + $0x88] sm:$0xff] }
  0x86   :  { %1331 = vmatprep.subr.bf16.mxu1 %v1330_v53  ;;  %v1352_v52 = vpack.c.bf16 %v625_v49, %v624_v46  ;;  %v642_v53 = vld [vmem:[#allocation8 + $0xc0] sm:$0xff]  ;;  %v680_v28 = vld [vmem:[#allocation8 + $0x1f0] sm:$0xff]  ;;  %v214_v46 = vlaneseq }
  0x87   :  { %v1354_v57 = vpack.c.bf16 %v643_v54, %v642_v53  ;;  %v632_v32 = vld [vmem:[#allocation8 + $0x70] sm:$0xff]  ;;  %v1740_v50 = vld [vmem:[%s1788_s3] sm:$0xff] }
  0x88   :  { %1301 = vmatpush1.bf16.msra.mxu0 %v1300_v59  ;;  %v1386_v59 = vpack.c.bf16 %v675_v58, %v674_v55 }
  0x89   :  { %1333 = vmatpush1.bf16.msra.mxu1 %v1332_v60  ;;  %1303 = vmatprep.subr.bf16.mxu0 %v1302_v61  ;;  %v626_v60 = vld [vmem:[#allocation8 + $0x40] sm:$0xff]  ;;  %v627_v61 = vld [vmem:[#allocation8 + $0x48] sm:$0xff] }
  0x8a   :  { %1335 = vmatprep.subr.bf16.mxu1 %v1334_v1  ;;  %v1356_v63 = vpack.c.bf16 %v627_v61, %v626_v60  ;;  %v659_v1 = vld [vmem:[#allocation8 + $0x148] sm:$0xff] }
  0x8b   :  { %v1388_v2 = vpack.c.bf16 %v659_v1, %v658_v62 }
  0x8c   :  { %1305 = vmatpush1.bf16.msra.mxu0 %v1304_v4  ;;  %v645_v4 = vld [vmem:[#allocation8 + $0xd8] sm:$0xff] }
  0x8d   :  { %1337 = vmatpush1.bf16.msra.mxu1 %v1336_v5  ;;  %1339 = vmatprep.subr.bf16.mxu0 %v1338_v9  ;;  %v676_v5 = vld [vmem:[#allocation8 + $0x1d0] sm:$0xff]  ;;  %v1358_v6 = vpack.c.bf16 %v645_v4, %v644_v3  ;;  %v629_v9 = vld [vmem:[#allocation8 + $0x58] sm:$0xff] }
  0x8e   :  { %1371 = vmatprep.subr.bf16.mxu1 %v1370_v13  ;;  %v1390_v10 = vpack.c.bf16 %v677_v7, %v676_v5  ;;  %v1360_v11 = vpack.c.bf16 %v629_v9, %v628_v8  ;;  %v661_v13 = vld [vmem:[#allocation8 + $0x158] sm:$0xff] }
  0x8f   :  { %461 = vmatmul.mubr.f32.vlgmr.msra.gmra.mrb[2].mxu0 %v1722_v48 }
  0x90   :  { %532 = vmatmul.mubr.f32.vlgmr.msra.gmra.mrb[2].mxu1 %v1722_v48  ;;  %1341 = vmatpush3.bf16.msra.mxu0 %v1340_v14  ;;  %v1342_v48 = vpack.c.bf16 %v637_v19, %v636_v18  ;;  %v1392_v14 = vpack.c.bf16 %v661_v13, %v660_v12  ;;  %v1362_v18 = vpack.c.bf16 %v647_v16, %v646_v15  ;;  %v679_v19 = vld [vmem:[#allocation8 + $0x1e8] sm:$0xff]  ;;  %v554_v13 = vld [vmem:[#allocation7] sm:$0xff] }
  0x91   :  { %1373 = vmatpush3.bf16.msra.mxu1 %v1372_v17  ;;  %v678_v17 = vld [vmem:[#allocation8 + $0x1e0] sm:$0xff] }
  0x92   :  { %1343 = vmatprep.subr.bf16.mxu0 %v1342_v48  ;;  %1375 = vmatprep.subr.bf16.mxu1 %v1374_v24  ;;  %v631_v48 = vld [vmem:[#allocation8 + $0x68] sm:$0xff]  ;;  %v1394_v21 = vpack.c.bf16 %v679_v19, %v678_v17  ;;  %v572_v17 = vld [vmem:[#allocation7 + $0x90] sm:$0xff] }
  0x93   :  { %v1364_v22 = vpack.c.bf16 %v631_v48, %v630_v20  ;;  %v663_v24 = vld [vmem:[#allocation8 + $0x168] sm:$0xff]  ;;  %v602_v48 = vld [vmem:[#allocation7 + $0x180] sm:$0xff] }
  0x94   :  { %1345 = vmatpush3.bf16.msra.mxu0 %v1344_v25  ;;  %v648_v25 = vld [vmem:[#allocation8 + $0xf0] sm:$0xff]  ;;  %v1396_v26 = vpack.c.bf16 %v663_v24, %v662_v23 }
  0x95   :  { %1377 = vmatpush3.bf16.msra.mxu1 %v1376_v29  ;;  %1347 = vmatprep.subr.bf16.mxu0 %v1346_v33  ;;  %v681_v29 = vld [vmem:[#allocation8 + $0x1f8] sm:$0xff]  ;;  %v1366_v30 = vpack.c.bf16 %v649_v27, %v648_v25  ;;  %v556_v24 = vld [vmem:[#allocation7 + $0x10] sm:$0xff]  ;;  %v586_v25 = vld [vmem:[#allocation7 + $0x100] sm:$0xff] }
  0x96   :  { %1379 = vmatprep.subr.bf16.mxu1 %v1378_v34  ;;  %v1398_v31 = vpack.c.bf16 %v681_v29, %v680_v28  ;;  %v633_v33 = vld [vmem:[#allocation8 + $0x78] sm:$0xff]  ;;  %v664_v34 = vld [vmem:[#allocation8 + $0x170] sm:$0xff] }
  0x97   :  { %v1368_v35 = vpack.c.bf16 %v633_v33, %v632_v32  ;;  %v1400_v37 = vpack.c.bf16 %v665_v36, %v664_v34  ;;  %v605_v32 = vld [vmem:[#allocation7 + $0x198] sm:$0xff]  ;;  %v575_v36 = vld [vmem:[#allocation7 + $0xa8] sm:$0xff] }
  0x98   :  { %1349 = vmatpush3.bf16.msra.mxu0 %v1348_v38  ;;  %v570_v38 = vld [vmem:[#allocation7 + $0x80] sm:$0xff] }
  0x99   :  { %1381 = vmatpush3.bf16.msra.mxu1 %v1380_v42  ;;  %1351 = vmatprep.subr.bf16.mxu0 %v1350_v43  ;;  %v1405_v40 = vpack.c.bf16 %v571_v39, %v570_v38 }
  0x9a   :  { %1383 = vmatprep.subr.bf16.mxu1 %v1382_v47  ;;  %v1734_v47 = vshrl.u32 %v214_v46, 7  ;;  %v589_v46 = vld [vmem:[#allocation7 + $0x118] sm:$0xff] }
  0x9c   :  { %1353 = vmatpush3.bf16.msra.mxu0 %v1352_v52  ;;  %v220_v49 = vsub.s32 1, %v1734_v47  ;;  %v228_v51 = vsub.s32 3, %v1734_v47  ;;  %v232_v53 = vsub.s32 4, %v1734_v47  ;;  %v240_v55 = vsub.s32 6, %v1734_v47 }
  0x9d   :  { %1385 = vmatpush3.bf16.msra.mxu1 %v1384_v56  ;;  %1355 = vmatprep.subr.bf16.mxu0 %v1354_v57  ;;  %v236_v56 = vsub.s32 5, %v1734_v47  ;;  %v244_v57 = vsub.s32 7, %v1734_v47  ;;  %v216_v39 = vsub.s32 0, %v1734_v47 }
  0x9e   :  { %1387 = vmatprep.subr.bf16.mxu1 %v1386_v59  ;;  %v221_v52 = vrot.slane %v1740_v50, %v220_v49  ;;  %v229_v54 = vrot.slane %v1740_v50, %v228_v51  ;;  %v233_v59 = vrot.slane %v1740_v50, %v232_v53  ;;  %v241_v61 = vrot.slane %v1740_v50, %v240_v55  ;;  %v606_v53 = vld [vmem:[#allocation7 + $0x1a0] sm:$0xff]  ;;  %v576_v55 = vld [vmem:[#allocation7 + $0xb0] sm:$0xff] }
  0x9f   :  { %v237_v62 = vrot.slane %v1740_v50, %v236_v56  ;;  %v577_v56 = vld [vmem:[#allocation7 + $0xb8] sm:$0xff] }
  0xa0   :  { %1357 = vmatpush3.bf16.msra.mxu0 %v1356_v63  ;;  %v245_v63 = vrot.slane %v1740_v50, %v244_v57  ;;  %v224_v57 = vsub.s32 2, %v1734_v47 }
  0xa1   :  { %1389 = vmatpush3.bf16.msra.mxu1 %v1388_v2  ;;  %1359 = vmatprep.subr.bf16.mxu0 %v1358_v6 }
  0xa2   :  { %1391 = vmatprep.subr.bf16.mxu1 %v1390_v10  ;;  %v824_v10 = vld [vmem:[%s1792_s7] sm:$0xff]  ;;  %v225_v47 = vrot.slane %v1740_v50, %v224_v57 }
  0xa4   :  { %1361 = vmatpush3.bf16.msra.mxu0 %v1360_v11  ;;  %v825_v11 = vld [vmem:[%s1792_s7 + $0x8] sm:$0xff] }
  0xa5   :  { %1393 = vmatpush3.bf16.msra.mxu1 %v1392_v14  ;;  %1363 = vmatprep.subr.bf16.mxu0 %v1362_v18  ;;  %v555_v14 = vld [vmem:[#allocation7 + $0x8] sm:$0xff]  ;;  %v573_v18 = vld [vmem:[#allocation7 + $0x98] sm:$0xff]  ;;  %v1403_v20 = vpack.c.bf16 %v825_v11, %v824_v10  ;;  %v562_v11 = vld [vmem:[#allocation7 + $0x40] sm:$0xff] }
  0xa6   :  { %1395 = vmatprep.subr.bf16.mxu1 %v1394_v21  ;;  %v603_v21 = vld [vmem:[#allocation7 + $0x188] sm:$0xff]  ;;  %v1407_v23 = vpack.c.bf16 %v555_v14, %v554_v13  ;;  %v1409_v29 = vpack.c.bf16 %v573_v18, %v572_v17  ;;  %v593_v13 = vld [vmem:[#allocation7 + $0x138] sm:$0xff]  ;;  %v580_v18 = vld [vmem:[#allocation7 + $0xd0] sm:$0xff] }
  0xa7   :  { %v1437_v34 = vpack.c.bf16 %v603_v21, %v602_v48  ;;  %v611_v17 = vld [vmem:[#allocation7 + $0x1c8] sm:$0xff]  ;;  %v564_v21 = vld [vmem:[#allocation7 + $0x50] sm:$0xff] }
  0xa8   :  { %1365 = vmatpush3.bf16.msra.mxu0 %v1364_v22 }
  0xa9   :  { %1397 = vmatpush3.bf16.msra.mxu1 %v1396_v26  ;;  %1367 = vmatprep.subr.bf16.mxu0 %v1366_v30  ;;  %v587_v26 = vld [vmem:[#allocation7 + $0x108] sm:$0xff]  ;;  %v557_v30 = vld [vmem:[#allocation7 + $0x18] sm:$0xff] }
  0xaa   :  { %1399 = vmatprep.subr.bf16.mxu1 %v1398_v31  ;;  %v604_v31 = vld [vmem:[#allocation7 + $0x190] sm:$0xff]  ;;  %v1439_v38 = vpack.c.bf16 %v587_v26, %v586_v25  ;;  %v565_v25 = vld [vmem:[#allocation7 + $0x58] sm:$0xff] }
  0xab   :  { %v612_v26 = vld [vmem:[#allocation7 + $0x1d0] sm:$0xff] }
  0xac   :  { %1369 = vmatpush3.bf16.msra.mxu0 %v1368_v35  ;;  %v574_v35 = vld [vmem:[#allocation7 + $0xa0] sm:$0xff] }
  0xad   :  { %1401 = vmatpush3.bf16.msra.mxu1 %v1400_v37  ;;  %1402 = vmatprep.subr.bf16.mxu0 %v1624_v41  ;;  %v823_v37 = vld [vmem:[%s1786_s1] sm:$0x1]  ;;  %v1441_v41 = vpack.c.bf16 %v605_v32, %v604_v31  ;;  %v1413_v51 = vpack.c.bf16 %v575_v36, %v574_v35  ;;  %v567_v36 = vld [vmem:[#allocation7 + $0x68] sm:$0xff] }
  0xae   :  { %1406 = vmatprep.subr.bf16.mxu1 %v1405_v40  ;;  %v1411_v40 = vpack.c.bf16 %v557_v30, %v556_v24  ;;  %v1427_v30 = vpack.c.bf16 %v565_v25, %v564_v21  ;;  %v566_v32 = vld [vmem:[#allocation7 + $0x60] sm:$0xff] }
 0x142   :  { %v1730_v42 = vpop.f32.mrb[0].mxu0 }
 0x143   :  { %v322_v43 = vpop.f32.mrb[1].mxu0  ;;  %v1732_v44 = vpop.f32.mrb[0].mxu1 }
 0x144   :  { %v393_v45 = vpop.f32.mrb[1].mxu1  ;;  %v323_v58 = vadd.f32 %v322_v43, %v221_v52  ;;  %v558_v43 = vld [vmem:[#allocation7 + $0x20] sm:$0xff]  ;;  %v559_v52 = vld [vmem:[#allocation7 + $0x28] sm:$0xff] }
 0x145   :  { %v394_v60 = vadd.f32 %v393_v45, %v229_v54  ;;  %v588_v45 = vld [vmem:[#allocation7 + $0x110] sm:$0xff]  ;;  %v607_v54 = vld [vmem:[#allocation7 + $0x1a8] sm:$0xff] }
 0x146   :  { %1481 = vtanh.f32 %v323_v58  ;;  %v1443_v58 = vpack.c.bf16 %v589_v46, %v588_v45  ;;  %v568_v46 = vld [vmem:[#allocation7 + $0x70] sm:$0xff] }
 0x147   :  { %1483 = vtanh.f32 %v394_v60  ;;  %v1445_v60 = vpack.c.bf16 %v607_v54, %v606_v53  ;;  %v569_v53 = vld [vmem:[#allocation7 + $0x78] sm:$0xff]  ;;  %v616_v54 = vld [vmem:[#allocation7 + $0x1f0] sm:$0xff] }
 0x150   :  { %v1482_v9 = vpop.eup %1481 }
 0x151   :  { %v1484_v12 = vpop.eup %1483  ;;  %v547_v16 = vmul.f32 %v1482_v9, %v1482_v9 }
 0x152   :  { %v549_v28 = vmul.f32 %v1484_v12, %v1484_v12  ;;  %v592_v12 = vld [vmem:[#allocation7 + $0x130] sm:$0xff] }
 0x153   :  { %v551_v33 = vsub.f32 1.0, %v547_v16  ;;  %v610_v16 = vld [vmem:[#allocation7 + $0x1c0] sm:$0xff] }
 0x154   :  { %v553_v49 = vsub.f32 1.0, %v549_v28  ;;  %v1453_v48 = vpack.c.bf16 %v611_v17, %v610_v16  ;;  %v582_v28 = vld [vmem:[#allocation7 + $0xe0] sm:$0xff] }
 0x162   :  { %v462_v1 = vpop.f32.mrb[2].mxu0 }
 0x163   :  { %v463_v2 = vadd.f32 %v462_v1, %v233_v59  ;;  %v533_v3 = vpop.f32.mrb[2].mxu1  ;;  %v464_v4 = vpop.f32.mrb[3].mxu0  ;;  %v217_v59 = vrot.slane %v1740_v50, %v216_v39  ;;  %v1417_v1 = vpack.c.bf16 %v577_v56, %v576_v55  ;;  %v392_v50 = vadd.f32 %v1732_v44, %v225_v47  ;;  %v584_v39 = vld [vmem:[#allocation7 + $0xf0] sm:$0xff]  ;;  %v617_v55 = vld [vmem:[#allocation7 + $0x1f8] sm:$0xff] }
 0x164   :  { %v534_v5 = vadd.f32 %v533_v3, %v241_v61  ;;  %v465_v6 = vadd.f32 %v464_v4, %v237_v62  ;;  %v535_v7 = vpop.f32.mrb[3].mxu1  ;;  %v560_v61 = vld [vmem:[#allocation7 + $0x30] sm:$0xff]  ;;  %v590_v62 = vld [vmem:[#allocation7 + $0x120] sm:$0xff]  ;;  %v609_v4 = vld [vmem:[#allocation7 + $0x1b8] sm:$0xff] }
 0x165   :  { %1485 = vtanh.f32 %v463_v2  ;;  %v536_v8 = vadd.f32 %v535_v7, %v245_v63  ;;  %v591_v63 = vld [vmem:[#allocation7 + $0x128] sm:$0xff]  ;;  %v561_v2 = vld [vmem:[#allocation7 + $0x38] sm:$0xff]  ;;  %v608_v3 = vld [vmem:[#allocation7 + $0x1b0] sm:$0xff] }
 0x166   :  { %1487 = vtanh.f32 %v534_v5  ;;  %v578_v5 = vld [vmem:[#allocation7 + $0xc0] sm:$0xff]  ;;  %v1447_v7 = vpack.c.bf16 %v591_v63, %v590_v62  ;;  %v1419_v9 = vpack.c.bf16 %v561_v2, %v560_v61  ;;  %v1449_v10 = vpack.c.bf16 %v609_v4, %v608_v3 }
 0x167   :  { %1489 = vtanh.f32 %v465_v6  ;;  %v579_v6 = vld [vmem:[#allocation7 + $0xc8] sm:$0xff] }
 0x168   :  { %1491 = vtanh.f32 %v536_v8  ;;  %v321_v8 = vadd.f32 %v1730_v42, %v217_v59  ;;  %v1421_v14 = vpack.c.bf16 %v579_v6, %v578_v5  ;;  %v1465_v59 = vpack.c.bf16 %v617_v55, %v616_v54  ;;  %v682_v6 = vld [vmem:[%s1791_s6] sm:$0x1]  ;;  %s1585_s6 = scalar_lea.vmem %s1049_s17, 16 }
 0x169   :  { %p1586_p4 = scmp.ne.s32.totalorder %s1049_s17, %s1585_s6  ;;  %p1591_p6 = scmp.lt.s32.totalorder %s1589_s18, %s1585_s6 }
 0x16a   :  { %1493 = vtanh.f32 %v321_v8 }
 0x16b   :  { %1495 = vtanh.f32 %v392_v50  ;;  %p1592_p7 = por %p1591_p6, %p1590_p5 }
 0x16d   :  { %p1593_p8 = pnand %p1592_p7, %p1586_p4 }
 0x16f   :  { %v1486_v15 = vpop.eup %1485 }
 0x170   :  { %v1488_v19 = vpop.eup %1487 }
 0x171   :  { %v1490_v22 = vpop.eup %1489 }
 0x172   :  { %v1492_v27 = vpop.eup %1491  ;;  %747 = vmatprep.mubr.f32.mxu0 %v1490_v22  ;;  %v594_v22 = vld [vmem:[#allocation7 + $0x140] sm:$0xff] }
 0x173   :  { %817 = vmatprep.mubr.f32.mxu1 %v1492_v27  ;;  %748 = vmatmul.mubr.f32.vlgmr.msra.gmra.mrb[4].mxu0 %v1486_v15  ;;  %v563_v15 = vld [vmem:[#allocation7 + $0x48] sm:$0xff]  ;;  %v613_v27 = vld [vmem:[#allocation7 + $0x1d8] sm:$0xff] }
 0x174   :  { %818 = vmatmul.mubr.f32.vlgmr.msra.gmra.mrb[4].mxu1 %v1488_v19  ;;  %1404 = vmatpush3.bf16.msra.mxu0 %v1403_v20  ;;  %v581_v19 = vld [vmem:[#allocation7 + $0xd8] sm:$0xff]  ;;  %v1451_v20 = vpack.c.bf16 %v593_v13, %v592_v12  ;;  %v1423_v42 = vpack.c.bf16 %v563_v15, %v562_v11  ;;  %v1457_v31 = vpack.c.bf16 %v613_v27, %v612_v26  ;;  %v1494_v56 = vpop.eup %1493 }
 0x175   :  { %1408 = vmatpush3.bf16.msra.mxu1 %v1407_v23  ;;  %965 = vmatprep.mubr.f32.mxu1 %v551_v33  ;;  %v595_v23 = vld [vmem:[#allocation7 + $0x148] sm:$0xff]  ;;  %v1425_v24 = vpack.c.bf16 %v581_v19, %v580_v18  ;;  %v596_v33 = vld [vmem:[#allocation7 + $0x150] sm:$0xff]  ;;  %v1496_v61 = vpop.eup %1495  ;;  %v546_v62 = vmul.f32 %v1494_v56, %v1494_v56 }
 0x176   :  { %1207 = vmatprep.mubr.msk.f32.mxu0 %vm1625_vm1, %v1623_v0  ;;  %1410 = vmatprep.subr.bf16.mxu1 %v1409_v29  ;;  %v1415_v0 = vpack.c.bf16 %v559_v52, %v558_v43  ;;  %v583_v29 = vld [vmem:[#allocation7 + $0xe8] sm:$0xff]  ;;  %v1455_v44 = vpack.c.bf16 %v595_v23, %v594_v22  ;;  %v1431_v43 = vpack.c.bf16 %v567_v36, %v566_v32 }
 0x177   :  { %1438 = vmatprep.subr.bf16.mxu0 %v1437_v34  ;;  %1208 = vmatmul.mubr.msk.f32.vlgmr.msra.gmra.mrb[6].mxu0 %vm826_vm0, %v823_v37  ;;  %v597_v34 = vld [vmem:[#allocation7 + $0x158] sm:$0xff]  ;;  %v1429_v35 = vpack.c.bf16 %v583_v29, %v582_v28  ;;  %v614_v37 = vld [vmem:[#allocation7 + $0x1e0] sm:$0xff]  ;;  %v550_v2 = vsub.f32 1.0, %v546_v62 }
 0x178   :  { %1440 = vmatpush3.bf16.msra.mxu0 %v1439_v38  ;;  %1035 = vmatprep.mubr.f32.mxu0 %v553_v49  ;;  %v615_v38 = vld [vmem:[#allocation7 + $0x1e8] sm:$0xff]  ;;  %v598_v49 = vld [vmem:[#allocation7 + $0x160] sm:$0xff] }
 0x179   :  { %1412 = vmatpush3.bf16.msra.mxu1 %v1411_v40  ;;  %1442 = vmatprep.subr.bf16.mxu0 %v1441_v41  ;;  %v585_v40 = vld [vmem:[#allocation7 + $0xf8] sm:$0xff]  ;;  %v1459_v41 = vpack.c.bf16 %v597_v34, %v596_v33  ;;  %v1461_v45 = vpack.c.bf16 %v615_v38, %v614_v37 }
 0x17a   :  { %1414 = vmatprep.subr.bf16.mxu1 %v1413_v51  ;;  %v599_v51 = vld [vmem:[#allocation7 + $0x168] sm:$0xff]  ;;  %v1433_v52 = vpack.c.bf16 %v585_v40, %v584_v39 }
 0x17b   :  { %v1463_v57 = vpack.c.bf16 %v599_v51, %v598_v49 }
 0x17c   :  { %1444 = vmatpush3.bf16.msra.mxu0 %v1443_v58  ;;  %v1435_v58 = vpack.c.bf16 %v569_v53, %v568_v46 }
 0x17d   :  { %1416 = vmatpush3.bf16.msra.mxu1 %v1415_v0  ;;  %1446 = vmatprep.subr.bf16.mxu0 %v1445_v60  ;;  %v600_v0 = vld [vmem:[#allocation7 + $0x170] sm:$0xff]  ;;  %v601_v60 = vld [vmem:[#allocation7 + $0x178] sm:$0xff] }
 0x17e   :  { %1418 = vmatprep.subr.bf16.mxu1 %v1417_v1  ;;  %v1467_v63 = vpack.c.bf16 %v601_v60, %v600_v0  ;;  %v548_v1 = vmul.f32 %v1496_v61, %v1496_v61 }
 0x180   :  { %1448 = vmatpush3.bf16.msra.mxu0 %v1447_v7  ;;  %v552_v3 = vsub.f32 1.0, %v548_v1 }
 0x181   :  { %1420 = vmatpush3.bf16.msra.mxu1 %v1419_v9  ;;  %1450 = vmatprep.subr.bf16.mxu0 %v1449_v10 }
 0x182   :  { %1422 = vmatprep.subr.bf16.mxu1 %v1421_v14 }
 0x184   :  { %1452 = vmatpush3.bf16.msra.mxu0 %v1451_v20 }
 0x185   :  { %1424 = vmatpush3.bf16.msra.mxu1 %v1423_v42  ;;  %1454 = vmatprep.subr.bf16.mxu0 %v1453_v48 }
 0x186   :  { %1426 = vmatprep.subr.bf16.mxu1 %v1425_v24 }
 0x188   :  { %1456 = vmatpush3.bf16.msra.mxu0 %v1455_v44 }
 0x189   :  { %1428 = vmatpush3.bf16.msra.mxu1 %v1427_v30  ;;  %1458 = vmatprep.subr.bf16.mxu0 %v1457_v31 }
 0x18a   :  { %1430 = vmatprep.subr.bf16.mxu1 %v1429_v35 }
 0x18c   :  { %1460 = vmatpush3.bf16.msra.mxu0 %v1459_v41 }
 0x18d   :  { %1432 = vmatpush3.bf16.msra.mxu1 %v1431_v43  ;;  %1462 = vmatprep.subr.bf16.mxu0 %v1461_v45 }
 0x18e   :  { %1434 = vmatprep.subr.bf16.mxu1 %v1433_v52 }
 0x190   :  { %1464 = vmatpush3.bf16.msra.mxu0 %v1463_v57 }
 0x191   :  { %1436 = vmatpush3.bf16.msra.mxu1 %v1435_v58  ;;  %1466 = vmatprep.subr.bf16.mxu0 %v1465_v59 }
 0x194   :  { %966 = vmatmul.mubr.f32.vlgmr.msra.gmra.mrb[6].mxu1 %v550_v2  ;;  %1468 = vmatpush3.bf16.msra.mxu0 %v1467_v63 }
 0x197   :  { %1036 = vmatmul.mubr.f32.vlgmr.msra.gmra.mrb[8].mxu0 %v552_v3 }
 0x246   :  { %v1092_v4 = vpop.f32.mrb[4].mxu0 }
 0x247   :  { %v1127_v5 = vpop.f32.mrb[4].mxu1  ;;  %v1093_v47 = vpop.f32.mrb[5].mxu0 }
 0x248   :  { %v1094_v7 = vadd.f32 %v1093_v47, %v1092_v4  ;;  %v1128_v8 = vpop.f32.mrb[5].mxu1 }
 0x249   :  { %v1129_v9 = vadd.f32 %v1128_v8, %v1127_v5 }
 0x24a   :  { %v750_v10 = vadd.f32 %v1094_v7, %v682_v6  ;;  %v896_v11 = vpop.f32.mrb[6].mxu0 }
 0x24b   :  { %v1209_v12 = vpop.f32.mrb[7].mxu0 }
 0x24c   :  { %v820_v13 = vadd.f32 %v1129_v9, %v750_v10 }
 0x24e   :  { %v900_v14 = vmul.f32 %v896_v11, %v820_v13 }
 0x267   :  { %v1165_v15 = vpop.f32.mrb[6].mxu1 }
 0x268   :  { %v1166_v16 = vpop.f32.mrb[7].mxu1 }
 0x269   :  { %v1167_v17 = vadd.f32 %v1166_v16, %v1165_v15 }
 0x26a   :  { %v1200_v18 = vpop.f32.mrb[8].mxu0 }
 0x26b   :  { %v968_v19 = vadd.f32 %v1167_v17, %v900_v14  ;;  %v1201_v50 = vpop.f32.mrb[9].mxu0 }
 0x26c   :  { %v1202_v20 = vadd.f32 %v1201_v50, %v1200_v18 }
 0x26e   :  { %v1038_v42 = vadd.f32 %v1202_v20, %v968_v19 }
 0x270   :  { %1041 = vst [vmem:[#allocation10] sm:$0x1] %v1038_v42 }
 0x271   :  { %1596 = shalt.err (!%p1593_p8)
}
 0x272   :  { %s1597_s20 = scalar_lea.hbm %s1793_s8, 16 }
 0x273   :  { %p1598_p9 = scmp.ne.s32.totalorder %s1793_s8, %s1597_s20  ;;  %p1601_p10 = scmp.lt.u32.totalorder %s1597_s20, %s1793_s8 }
 0x275   :  { %p1603_p11 = pnand %p1601_p10, %p1598_p9 }
 0x277   :  { %1606 = shalt.err (!%p1603_p11)
}
 0x278   :  { %1051 = dma.vmem_to_hbm [thread:$0]  %s1049_s17, 16, %s1793_s8, [#allocation4]  }
 0x279   :  { %1613 = dma.done.wait [#allocation4], 16  }
 0x27a   :  { %1614 = vsyncadd [#allocation4], 4294967280 }
 0x27b   :  { %1055 = vsyncpa [#allocation3], 1 }
 0x27c   :  { %1056 = vsyncpa [#allocation6], 1 }
 0x27d   :  { %1057 = vsyncpa [#allocation9], 1 }
 0x27e   :  { %1058 = vsyncpa [#allocation4], 1 }

</bundles_post_ra>
